<compile_context>
chip_gen: v7x
topology: tpu7x:2x2x1
jax: 0.10.0
libtpu: 0.0.40
codegen_flags: <defaults>
</compile_context>

<pallas_src>
import functools

import jax
import jax.numpy as jnp
import numpy as np
from jax import lax
from jax.experimental import pallas as pl
from jax.experimental.pallas import tpu as pltpu

BN_EPS = 1e-5


def _round_up(x, m):
    return (x + m - 1) // m * m


# ----------------------------------------------------------------------------
# Pallas kernel: the whole decoder, fused, single invocation (no grid)
# ----------------------------------------------------------------------------
def _decoder_kernel(x_ref, *refs, meta):
    # x_ref : (N, C0*L0) flattened NCW input
    # refs  : one stacked parameter slab per block, then o_ref
    #   slab rows: [0,cl)        dense ConvTranspose1d operator (Cin*Lin, W)
    #              [off_avg,+W)  block-diag per-channel averaging, incl 1/(N*Lout)
    #              off_gb        gamma (repeated along L), off_gb+1  beta
    # meta  : static per-block (cl, off_avg, off_gb, W)
    o_ref = refs[-1]
    mats = refs[:-1]

    # Leading ReLU of block 0 only; the trailing ReLU of block b doubles as the
    # leading ReLU of block b+1 (idempotent).
    h = jnp.maximum(x_ref[...], 0.0)

    for b, (cl, off_avg, off_gb, W) in enumerate(meta):   # static unroll
        m = mats[b]
        op = m[0:cl, :]                      # (Cin*Lin, Cout*Lout)
        avg = m[off_avg:off_avg + W, :]      # (W, W) block-diag averaging
        gamma = m[off_gb:off_gb + 1, :]      # (1, W)
        beta = m[off_gb + 1:off_gb + 2, :]   # (1, W)

        # ConvTranspose1d: ONE lane-dense MXU matmul per block.
        # (conv bias omitted: exactly cancelled by BN mean subtraction below)
        a = jnp.dot(h, op, preferred_element_type=jnp.float32)

        # BatchNorm1d (training mode, batch stats): single stats matmul.
        s1 = jnp.sum(a, axis=0, keepdims=True)        # sum over batch
        s2 = jnp.sum(a * a, axis=0, keepdims=True)    # sum of squares
        stats = jnp.dot(jnp.concatenate([s1, s2], axis=0), avg,
                        preferred_element_type=jnp.float32)
        mean = stats[0:1, :]
        var = jnp.maximum(stats[1:2, :] - mean * mean, 0.0)

        h = (a - mean) * lax.rsqrt(var + BN_EPS) * gamma + beta
        h = jnp.maximum(h, 0.0)              # trailing ReLU

    o_ref[...] = h.astype(o_ref.dtype)


# ----------------------------------------------------------------------------
# One-time parameter preparation (hoisted out of the forward path)
# ----------------------------------------------------------------------------
def init_decoder_params(config_decoder, key):
    params = []
    for idx, cfg in enumerate(config_decoder):
        cin, cout, K = cfg["in_channels"], cfg["out_channels"], cfg["kernel_size"]
        k1, k2, k3, k4 = jax.random.split(jax.random.fold_in(key, idx), 4)
        bound = 1.0 / np.sqrt(cin * K)
        w = jax.random.uniform(k1, (cin, cout, K), jnp.float32, -bound, bound)
        b = jax.random.uniform(k2, (cout,), jnp.float32, -bound, bound)
        gamma = 1.0 + 0.1 * jax.random.normal(k3, (cout,), jnp.float32)
        beta = 0.1 * jax.random.normal(k4, (cout,), jnp.float32)
        params.append((w, b, gamma, beta))
    return params


def prepare_decoder_params(params, config_decoder, N, Lin0):
    """Fold flip/stride/padding/output_padding into dense operators and stack
    all per-block parameters into one sublane-aligned slab per block."""
    prepped, meta = [], []
    Lin = Lin0
    cout = None
    for (w, b, gamma, beta), cfg in zip(params, config_decoder):
        cin, cout, K = cfg["in_channels"], cfg["out_channels"], cfg["kernel_size"]
        s = cfg.get("stride", 1)
        p = cfg.get("padding", 0)
        opad = cfg.get("output_padding", 0)
        Lout = (Lin - 1) * s - 2 * p + K + opad
        W = cout * Lout

        # Dense ConvTranspose1d operator (scatter rule l = i*s + k - p).
        w_np = np.asarray(w, dtype=np.float32)          # (Cin, Cout, K)
        M = np.zeros((cin * Lin, W), np.float32)
        co_idx = np.arange(cout) * Lout
        for ci in range(cin):
            for i in range(Lin):
                for k in range(K):
                    l = i * s + k - p
                    if 0 <= l < Lout:
                        M[ci * Lin + i, co_idx + l] += w_np[ci, :, k]

        # Block-diagonal per-channel averaging matrix (includes 1/(N*Lout)).
        avg = np.kron(np.eye(cout, dtype=np.float32),
                      np.full((Lout, Lout), 1.0 / (N * Lout), np.float32))

        # NOTE: conv bias `b` is intentionally dropped (cancelled by BN).
        cl = cin * Lin
        off_avg = _round_up(cl, 8)          # keep segments sublane-aligned
        off_gb = _round_up(off_avg + W, 8)
        slab = np.zeros((off_gb + 2, W), np.float32)
        slab[:cl] = M
        slab[off_avg:off_avg + W] = avg
        slab[off_gb] = np.repeat(np.asarray(gamma, np.float32), Lout)
        slab[off_gb + 1] = np.repeat(np.asarray(beta, np.float32), Lout)

        prepped.append(jnp.asarray(slab))
        meta.append((cl, off_avg, off_gb, W))
        Lin = Lout
    return prepped, tuple(meta), (cout, Lin)


# ----------------------------------------------------------------------------
# Forward: ONE fused, grid-less pallas_call for the whole decoder
# ----------------------------------------------------------------------------
def my_decoder_forward(x_ncl, prepped, meta, out_cl):
    """x_ncl: (N, C, L) like PyTorch NCW. Returns (N, C_out, L_out)."""
    C_out, L_out = out_cl
    N = x_ncl.shape[0]
    h = x_ncl.reshape(N, -1).astype(jnp.float32)        # NCW flatten (free)

    in_arrays = [h] + list(prepped)
    vmem_spec = pl.BlockSpec(memory_space=pltpu.MemorySpace.VMEM)

    out_flat = pl.pallas_call(
        functools.partial(_decoder_kernel, meta=meta),
        out_shape=jax.ShapeDtypeStruct((N, C_out * L_out), jnp.float32),
        in_specs=[vmem_spec] * len(in_arrays),
        out_specs=vmem_spec,
    )(*in_arrays)
    return out_flat.reshape(N, C_out, L_out)            # split last dim (free)


# ----------------------------------------------------------------------------
# Pure-JAX reference (independent formulation; KEEPS the conv bias, which the
# kernel drops -- the match also verifies the bias/BN cancellation).
# ----------------------------------------------------------------------------
def _ref_block(x_ncl, params, cfg):
    w, b, gamma, beta = params
    N, Cin, Lin = x_ncl.shape
    Cout = cfg["out_channels"]
    K = cfg["kernel_size"]
    stride, padding, outpad = cfg["stride"], cfg["padding"], cfg["output_padding"]
    x = jnp.maximum(x_ncl, 0.0)
    Lout = (Lin - 1) * stride - 2 * padding + K + outpad
    full = jnp.zeros((N, Cout, Lout + 2 * padding), jnp.float32)
    for i in range(Lin):
        for k in range(K):
            full = full.at[:, :, i * stride + k].add(
                jnp.einsum("nc,cd->nd", x[:, :, i], w[:, :, k]))
    y = full[:, :, padding:padding + Lout] + b[None, :, None]
    mean = jnp.mean(y, axis=(0, 2), keepdims=True)
    var = jnp.mean((y - mean) ** 2, axis=(0, 2), keepdims=True)
    y = (y - mean) * lax.rsqrt(var + BN_EPS)
    y = y * gamma[None, :, None] + beta[None, :, None]
    return jnp.maximum(y, 0.0)


def _ref_forward(x_ncl, params, config_decoder):
    h = x_ncl
    for p, cfg in zip(params, config_decoder):
        h = _ref_block(h, p, cfg)
    return h


# ----------------------------------------------------------------------------
if __name__ == "__main__":
    config_decoder = [
        dict(in_channels=4, out_channels=8, kernel_size=3, stride=2,
             padding=1, output_padding=1),
        dict(in_channels=8, out_channels=4, kernel_size=3, stride=2,
             padding=1, output_padding=1),
    ]

    key = jax.random.PRNGKey(0)
    kx, kp = jax.random.split(key)
    N, C0, L0 = 2, 4, 8
    x = jax.random.normal(kx, (N, C0, L0), jnp.float32)   # (N, C, L) NCW
    params = init_decoder_params(config_decoder, kp)

    # One-time param prep (hoisted out of the forward path).
    prepped, meta, out_cl = prepare_decoder_params(params, config_decoder, N, L0)

    out = my_decoder_forward(x, prepped, meta, out_cl)
    out = jax.block_until_ready(out)

    ref = jax.block_until_ready(_ref_forward(x, params, config_decoder))
    assert out.shape == (2, 4, 32), out.shape
    np.testing.assert_allclose(np.asarray(out), np.asarray(ref),
                               rtol=1e-4, atol=1e-4)
    print("KERNEL_OK")
</pallas_src>

<mosaic_0001>
module attributes {stable_mosaic.version = 11 : i64} {
  func.func @_decoder_kernel(%arg0: memref<2x32xf32, #tpu.memory_space<vmem>>, %arg1: memref<162x128xf32, #tpu.memory_space<vmem>>, %arg2: memref<258x128xf32, #tpu.memory_space<vmem>>, %arg3: memref<2x128xf32, #tpu.memory_space<vmem>>) attributes {dimension_semantics = [], scalar_prefetch = 0 : i64, scratch_operands = 0 : i64, tpu.core_type = #tpu.core_type<tc>} {
    %c0 = arith.constant 0 : index
    %c0_0 = arith.constant 0 : index
    %0 = vector.load %arg0[%c0, %c0_0] : memref<2x32xf32, #tpu.memory_space<vmem>>, vector<2x32xf32>
    %cst = arith.constant 0.000000e+00 : f32
    %1 = vector.broadcast %cst : f32 to vector<2x32xf32>
    %2 = arith.maximumf %0, %1 : vector<2x32xf32>
    %c0_1 = arith.constant 0 : index
    %c0_2 = arith.constant 0 : index
    %3 = vector.load %arg1[%c0_1, %c0_2] : memref<162x128xf32, #tpu.memory_space<vmem>>, vector<32x128xf32>
    %c32 = arith.constant 32 : index
    %c0_3 = arith.constant 0 : index
    %4 = vector.load %arg1[%c32, %c0_3] : memref<162x128xf32, #tpu.memory_space<vmem>>, vector<128x128xf32>
    %c160 = arith.constant 160 : index
    %c0_4 = arith.constant 0 : index
    %5 = vector.load %arg1[%c160, %c0_4] : memref<162x128xf32, #tpu.memory_space<vmem>>, vector<1x128xf32>
    %c161 = arith.constant 161 : index
    %c0_5 = arith.constant 0 : index
    %6 = vector.load %arg1[%c161, %c0_5] : memref<162x128xf32, #tpu.memory_space<vmem>>, vector<1x128xf32>
    %cst_6 = arith.constant dense<0.000000e+00> : vector<2x128xf32>
    %7 = tpu.matmul %2, %3, %cst_6 {dimension_numbers = #tpu.dot_dimension_numbers<[1], [0], [0], [1], [0, 0, 1, 1], [], []>} : vector<2x32xf32>, vector<32x128xf32>, vector<2x128xf32> -> vector<2x128xf32>
    %cst_7 = arith.constant dense<0.000000e+00> : vector<128xf32>
    %8 = vector.multi_reduction <add>, %7, %cst_7 [0] : vector<2x128xf32> to vector<128xf32>
    %9 = vector.shape_cast %8 : vector<128xf32> to vector<1x128xf32>
    %10 = arith.mulf %7, %7 : vector<2x128xf32>
    %cst_8 = arith.constant dense<0.000000e+00> : vector<128xf32>
    %11 = vector.multi_reduction <add>, %10, %cst_8 [0] : vector<2x128xf32> to vector<128xf32>
    %12 = vector.shape_cast %11 : vector<128xf32> to vector<1x128xf32>
    %13 = tpu.concatenate %9, %12 in 0 : vector<1x128xf32>, vector<1x128xf32> -> vector<2x128xf32>
    %cst_9 = arith.constant dense<0.000000e+00> : vector<2x128xf32>
    %14 = tpu.matmul %13, %4, %cst_9 {dimension_numbers = #tpu.dot_dimension_numbers<[1], [0], [0], [1], [0, 0, 1, 1], [], []>} : vector<2x128xf32>, vector<128x128xf32>, vector<2x128xf32> -> vector<2x128xf32>
    %15 = vector.extract_strided_slice %14 {offsets = [0, 0], sizes = [1, 128], strides = [1, 1]} : vector<2x128xf32> to vector<1x128xf32>
    %16 = vector.extract_strided_slice %14 {offsets = [1, 0], sizes = [1, 128], strides = [1, 1]} : vector<2x128xf32> to vector<1x128xf32>
    %17 = arith.mulf %15, %15 : vector<1x128xf32>
    %18 = arith.subf %16, %17 : vector<1x128xf32>
    %cst_10 = arith.constant 0.000000e+00 : f32
    %19 = vector.broadcast %cst_10 : f32 to vector<1x128xf32>
    %20 = arith.maximumf %18, %19 : vector<1x128xf32>
    %21 = vector.broadcast %15 : vector<1x128xf32> to vector<2x128xf32>
    %22 = arith.subf %7, %21 : vector<2x128xf32>
    %cst_11 = arith.constant 9.99999974E-6 : f32
    %23 = vector.broadcast %cst_11 : f32 to vector<1x128xf32>
    %24 = arith.addf %20, %23 : vector<1x128xf32>
    %25 = math.rsqrt %24 : vector<1x128xf32>
    %26 = vector.broadcast %25 : vector<1x128xf32> to vector<2x128xf32>
    %27 = arith.mulf %22, %26 : vector<2x128xf32>
    %28 = vector.broadcast %5 : vector<1x128xf32> to vector<2x128xf32>
    %29 = arith.mulf %27, %28 : vector<2x128xf32>
    %30 = vector.broadcast %6 : vector<1x128xf32> to vector<2x128xf32>
    %31 = arith.addf %29, %30 : vector<2x128xf32>
    %cst_12 = arith.constant 0.000000e+00 : f32
    %32 = vector.broadcast %cst_12 : f32 to vector<2x128xf32>
    %33 = arith.maximumf %31, %32 : vector<2x128xf32>
    %c0_13 = arith.constant 0 : index
    %c0_14 = arith.constant 0 : index
    %34 = vector.load %arg2[%c0_13, %c0_14] : memref<258x128xf32, #tpu.memory_space<vmem>>, vector<128x128xf32>
    %c128 = arith.constant 128 : index
    %c0_15 = arith.constant 0 : index
    %35 = vector.load %arg2[%c128, %c0_15] : memref<258x128xf32, #tpu.memory_space<vmem>>, vector<128x128xf32>
    %c256 = arith.constant 256 : index
    %c0_16 = arith.constant 0 : index
    %36 = vector.load %arg2[%c256, %c0_16] : memref<258x128xf32, #tpu.memory_space<vmem>>, vector<1x128xf32>
    %c257 = arith.constant 257 : index
    %c0_17 = arith.constant 0 : index
    %37 = vector.load %arg2[%c257, %c0_17] : memref<258x128xf32, #tpu.memory_space<vmem>>, vector<1x128xf32>
    %cst_18 = arith.constant dense<0.000000e+00> : vector<2x128xf32>
    %38 = tpu.matmul %33, %34, %cst_18 {dimension_numbers = #tpu.dot_dimension_numbers<[1], [0], [0], [1], [0, 0, 1, 1], [], []>} : vector<2x128xf32>, vector<128x128xf32>, vector<2x128xf32> -> vector<2x128xf32>
    %cst_19 = arith.constant dense<0.000000e+00> : vector<128xf32>
    %39 = vector.multi_reduction <add>, %38, %cst_19 [0] : vector<2x128xf32> to vector<128xf32>
    %40 = vector.shape_cast %39 : vector<128xf32> to vector<1x128xf32>
    %41 = arith.mulf %38, %38 : vector<2x128xf32>
    %cst_20 = arith.constant dense<0.000000e+00> : vector<128xf32>
    %42 = vector.multi_reduction <add>, %41, %cst_20 [0] : vector<2x128xf32> to vector<128xf32>
    %43 = vector.shape_cast %42 : vector<128xf32> to vector<1x128xf32>
    %44 = tpu.concatenate %40, %43 in 0 : vector<1x128xf32>, vector<1x128xf32> -> vector<2x128xf32>
    %cst_21 = arith.constant dense<0.000000e+00> : vector<2x128xf32>
    %45 = tpu.matmul %44, %35, %cst_21 {dimension_numbers = #tpu.dot_dimension_numbers<[1], [0], [0], [1], [0, 0, 1, 1], [], []>} : vector<2x128xf32>, vector<128x128xf32>, vector<2x128xf32> -> vector<2x128xf32>
    %46 = vector.extract_strided_slice %45 {offsets = [0, 0], sizes = [1, 128], strides = [1, 1]} : vector<2x128xf32> to vector<1x128xf32>
    %47 = vector.extract_strided_slice %45 {offsets = [1, 0], sizes = [1, 128], strides = [1, 1]} : vector<2x128xf32> to vector<1x128xf32>
    %48 = arith.mulf %46, %46 : vector<1x128xf32>
    %49 = arith.subf %47, %48 : vector<1x128xf32>
    %cst_22 = arith.constant 0.000000e+00 : f32
    %50 = vector.broadcast %cst_22 : f32 to vector<1x128xf32>
    %51 = arith.maximumf %49, %50 : vector<1x128xf32>
    %52 = vector.broadcast %46 : vector<1x128xf32> to vector<2x128xf32>
    %53 = arith.subf %38, %52 : vector<2x128xf32>
    %cst_23 = arith.constant 9.99999974E-6 : f32
    %54 = vector.broadcast %cst_23 : f32 to vector<1x128xf32>
    %55 = arith.addf %51, %54 : vector<1x128xf32>
    %56 = math.rsqrt %55 : vector<1x128xf32>
    %57 = vector.broadcast %56 : vector<1x128xf32> to vector<2x128xf32>
    %58 = arith.mulf %53, %57 : vector<2x128xf32>
    %59 = vector.broadcast %36 : vector<1x128xf32> to vector<2x128xf32>
    %60 = arith.mulf %58, %59 : vector<2x128xf32>
    %61 = vector.broadcast %37 : vector<1x128xf32> to vector<2x128xf32>
    %62 = arith.addf %60, %61 : vector<2x128xf32>
    %cst_24 = arith.constant 0.000000e+00 : f32
    %63 = vector.broadcast %cst_24 : f32 to vector<2x128xf32>
    %64 = arith.maximumf %62, %63 : vector<2x128xf32>
    %c0_25 = arith.constant 0 : index
    %c0_26 = arith.constant 0 : index
    %65 = vector.load %arg3[%c0_25, %c0_26] : memref<2x128xf32, #tpu.memory_space<vmem>>, vector<2x128xf32>
    tpu.vector_store %arg3[%c0_25, %c0_26], %64 {strides = array<i32>} : memref<2x128xf32, #tpu.memory_space<vmem>>, vector<2x128xf32>,
    return
  }
}

</mosaic_0001>

<bundles_post_ra>
// kernel: tpu_custom_call.1
= control target key start
LH: loop header
LB: loop body
LE: loop exit
PB: predicated region body
PF: predicated region fallthrough
CT: control target
= control target key end

     0   :  { %8 = vsyncpa [#allocation3], 0  ;;  %s1000_s0 = inlined_call_operand.hbm [shape: f32[2,32], index: 0, kind: input, shape index: {}]   ;;  %s1001_s1 = inlined_call_operand.hbm [shape: f32[162,128], index: 1, kind: input, shape index: {}]   ;;  %s1002_s2 = inlined_call_operand.hbm [shape: f32[258,128], index: 2, kind: input, shape index: {}]   ;;  %s1003_s3 = inlined_call_operand.hbm [shape: f32[2,128], index: 3, kind: output, shape index: {}]  }
   0x1   :  { %9 = vsyncpa [#allocation6], 0 }
   0x2   :  { %10 = vsyncpa [#allocation4], 0  ;;  %s867_s12 = smov [#allocation5]   ;;  %s773_s16 = scalar_lea.hbm %s1001_s1, 2688 }
   0x3   :  { %s26_s13 = sshll.u32 %s867_s12, 4  ;;  %p774_p0 = scmp.ne.s32.totalorder %s1001_s1, %s773_s16  ;;  %s27_s13 = int_to_ptr.vmem [resolvable:$true] %s26_s13 }
   0x4   :  { %p777_p1 = scmp.lt.u32.totalorder %s773_s16, %s1001_s1 }
   0x6   :  { %p779_p2 = pnand %p777_p1, %p774_p0 }
   0x8   :  { %782 = shalt.err (!%p779_p2)
}
   0x9   :  { %s783_s21 = scalar_lea.vmem %s27_s13, 2688  ;;  %p788_p4 = scmp.lt.s32.totalorder %s27_s13, %s27_s13 }
   0xa   :  { %p784_p3 = scmp.ne.s32.totalorder %s27_s13, %s783_s21  ;;  %p789_p5 = scmp.lt.s32.totalorder %s783_s21, %s783_s21 }
   0xc   :  { %p790_p6 = por %p789_p5, %p788_p4 }
   0xe   :  { %p791_p7 = pnand %p790_p6, %p784_p3 }
  0x10   :  { %794 = shalt.err (!%p791_p7)
}
  0x11   :  { %s868_s22 = smov 128   ;;  %s869_s23 = smov 8  }
  0x12   :  { %32 = dma.hbm_to_vmem [thread:$0]  %s1001_s1, 2688, %s27_s13, [#allocation6], %s868_s22, %s868_s22, %s869_s23  }
  0x13   :  { %s870_s26 = smov [#allocation2]   ;;  %s871_s28 = smov [#allocation7]  }
  0x14   :  { %s17_s27 = sshll.u32 %s870_s26, 4  ;;  %s38_s29 = sshll.u32 %s871_s28, 4  ;;  %s18_s27 = int_to_ptr.vmem [resolvable:$true] %s17_s27  ;;  %s39_s29 = int_to_ptr.vmem [resolvable:$true] %s38_s29 }
  0x15   :  { %s795_s5 = scalar_lea.hbm %s1000_s0, 32 }
  0x16   :  { %p796_p8 = scmp.ne.s32.totalorder %s1000_s0, %s795_s5  ;;  %p799_p9 = scmp.lt.u32.totalorder %s795_s5, %s1000_s0 }
  0x18   :  { %p801_p10 = pnand %p799_p9, %p796_p8 }
  0x1a   :  { %804 = shalt.err (!%p801_p10)
}
  0x1b   :  { %s805_s1 = scalar_lea.vmem %s18_s27, 32  ;;  %p810_p12 = scmp.lt.s32.totalorder %s18_s27, %s18_s27 }
  0x1c   :  { %p806_p11 = scmp.ne.s32.totalorder %s18_s27, %s805_s1  ;;  %p811_p13 = scmp.lt.s32.totalorder %s805_s1, %s805_s1 }
  0x1e   :  { %p812_p0 = por %p811_p13, %p810_p12 }
  0x20   :  { %p813_p1 = pnand %p812_p0, %p806_p11 }
  0x22   :  { %816 = shalt.err (!%p813_p1)
}
  0x23   :  { %20 = dma.hbm_to_vmem [thread:$0]  %s1000_s0, 32, %s18_s27, [#allocation3]  }
  0x24   :  { %s817_s14 = scalar_lea.hbm %s1002_s2, 4224 }
  0x25   :  { %p818_p2 = scmp.ne.s32.totalorder %s1002_s2, %s817_s14  ;;  %p821_p3 = scmp.lt.u32.totalorder %s817_s14, %s1002_s2 }
  0x27   :  { %p823_p4 = pnand %p821_p3, %p818_p2 }
  0x29   :  { %826 = shalt.err (!%p823_p4)
}
  0x2a   :  { %s827_s19 = scalar_lea.vmem %s39_s29, 4224  ;;  %p832_p6 = scmp.lt.s32.totalorder %s39_s29, %s39_s29 }
  0x2b   :  { %p828_p5 = scmp.ne.s32.totalorder %s39_s29, %s827_s19  ;;  %p833_p7 = scmp.lt.s32.totalorder %s827_s19, %s827_s19 }
  0x2d   :  { %p834_p8 = por %p833_p7, %p832_p6 }
  0x2f   :  { %p835_p9 = pnand %p834_p8, %p828_p5 }
  0x31   :  { %838 = shalt.err (!%p835_p9)
}
  0x32   :  { %44 = dma.hbm_to_vmem [thread:$0]  %s1002_s2, 4224, %s39_s29, [#allocation6], %s868_s22, %s868_s22, %s869_s23  }
  0x33   :  { %861 = dma.done.wait [#allocation3], 32  }
  0x34   :  { %862 = vsyncadd [#allocation3], 4294967264 }
  0x35   :  { %863 = dma.done.wait [#allocation6], 6912  }
  0x36   :  { %864 = vsyncadd [#allocation6], 4294960384  ;;  %v872_v0 = vmov 0.0|0.0   ;;  %vm873_vm0 = vmmov 0   ;;  %v874_v1 = vmov 0.0   ;;  %v56_v2 = vld [vmem:[#allocation5] sm:$0xff] }
  0x37   :  { %682 = vmatprep.subr.bf16.mxu0 %v872_v0  ;;  %574 = vmatprep.mubr.msk.f32.mxu0 %vm873_vm0, %v874_v1  ;;  %v57_v3 = vld [vmem:[#allocation5 + $0x8] sm:$0xff]  ;;  %v58_v4 = vld [vmem:[#allocation5 + $0x10] sm:$0xff]  ;;  %v59_v6 = vld [vmem:[#allocation5 + $0x18] sm:$0xff]  ;;  %vm78_vm1 = vcmask 261120   ;;  %vm152_vm2 = vcmask 1041408   ;;  %vm168_vm3 = vcmask 1040384  }
  0x38   :  { %688 = vmatprep.subr.bf16.mxu1 %v872_v0  ;;  %609 = vmatprep.mubr.msk.f32.mxu1 %vm873_vm0, %v874_v1  ;;  %v683_v5 = vpack.c.bf16 %v57_v3, %v56_v2  ;;  %v60_v7 = vld [vmem:[#allocation5 + $0x20] sm:$0xff]  ;;  %v61_v8 = vld [vmem:[#allocation5 + $0x28] sm:$0xff]  ;;  %v62_v9 = vld [vmem:[#allocation5 + $0x30] sm:$0xff]  ;;  %v686_v11 = vpack.c.bf16 %v59_v6, %v58_v4  ;;  %s875_s2 = smov [#allocation8]  }
  0x39   :  { %v63_v10 = vld [vmem:[#allocation5 + $0x38] sm:$0xff]  ;;  %v689_v13 = vpack.c.bf16 %v61_v8, %v60_v7  ;;  %v64_v16 = vld [vmem:[#allocation5 + $0x40] sm:$0xff]  ;;  %v65_v17 = vld [vmem:[#allocation5 + $0x48] sm:$0xff]  ;;  %s495_s21 = sshll.u32 %s875_s2, 4  ;;  %s496_s21 = int_to_ptr.vmem [resolvable:$true] %s495_s21 }
  0x3a   :  { %684 = vmatpush3.bf16.msra.mxu0 %v683_v5  ;;  %v54_v12 = vld [vmem:[#allocation2] sm:$0x3]  ;;  %v692_v14 = vpack.c.bf16 %v63_v10, %v62_v9  ;;  %v695_v18 = vpack.c.bf16 %v65_v17, %v64_v16  ;;  %v66_v19 = vld [vmem:[#allocation5 + $0x50] sm:$0xff]  ;;  %v68_v22 = vld [vmem:[#allocation5 + $0x60] sm:$0xff]  ;;  %s839_s22 = scalar_lea.vmem %s496_s21, 32  ;;  %p844_p11 = scmp.lt.s32.totalorder %s496_s21, %s496_s21 }
  0x3b   :  { %685 = vmatprep.subr.bf16.mxu0 %v872_v0  ;;  %690 = vmatpush3.bf16.msra.mxu1 %v689_v13  ;;  %v55_v15 = vmax.f32 %v54_v12, 0.0  ;;  %v67_v20 = vld [vmem:[#allocation5 + $0x58] sm:$0xff]  ;;  %v69_v23 = vld [vmem:[#allocation5 + $0x68] sm:$0xff]  ;;  %v70_v25 = vld [vmem:[#allocation5 + $0x70] sm:$0xff]  ;;  %p840_p10 = scmp.ne.s32.totalorder %s496_s21, %s839_s22  ;;  %p845_p12 = scmp.lt.s32.totalorder %s839_s22, %s839_s22 }
  0x3c   :  { %691 = vmatprep.subr.bf16.mxu1 %v872_v0  ;;  %v698_v21 = vpack.c.bf16 %v67_v20, %v66_v19  ;;  %v701_v24 = vpack.c.bf16 %v69_v23, %v68_v22  ;;  %v71_v26 = vld [vmem:[#allocation5 + $0x78] sm:$0xff]  ;;  %v72_v28 = vld [vmem:[#allocation5 + $0x80] sm:$0xff]  ;;  %v73_v29 = vld [vmem:[#allocation5 + $0x88] sm:$0xff] }
  0x3d   :  { %v704_v27 = vpack.c.bf16 %v71_v26, %v70_v25  ;;  %v707_v30 = vpack.c.bf16 %v73_v29, %v72_v28  ;;  %v74_v31 = vld [vmem:[#allocation5 + $0x90] sm:$0xff]  ;;  %v75_v32 = vld [vmem:[#allocation5 + $0x98] sm:$0xff]  ;;  %v269_v52 = vld [vmem:[#allocation7] sm:$0xff]  ;;  %v246_v25 = vlaneseq  ;;  %p846_p13 = por %p845_p12, %p844_p11 }
  0x3e   :  { %687 = vmatpush3.bf16.msra.mxu0 %v686_v11  ;;  %v710_v33 = vpack.c.bf16 %v75_v32, %v74_v31  ;;  %v270_v53 = vld [vmem:[#allocation7 + $0x8] sm:$0xff]  ;;  %v271_v55 = vld [vmem:[#allocation7 + $0x10] sm:$0xff]  ;;  %v272_v56 = vld [vmem:[#allocation7 + $0x18] sm:$0xff] }
  0x3f   :  { %712 = vmatprep.subr.bf16.mxu0 %v872_v0  ;;  %693 = vmatpush3.bf16.msra.mxu1 %v692_v14  ;;  %v713_v54 = vpack.c.bf16 %v270_v53, %v269_v52  ;;  %v716_v57 = vpack.c.bf16 %v272_v56, %v271_v55  ;;  %v273_v58 = vld [vmem:[#allocation7 + $0x20] sm:$0xff]  ;;  %v274_v59 = vld [vmem:[#allocation7 + $0x28] sm:$0xff]  ;;  %v275_v61 = vld [vmem:[#allocation7 + $0x30] sm:$0xff]  ;;  %v977_v26 = vshrl.u32 %v246_v25, 7  ;;  %p847_p0 = pnand %p846_p13, %p840_p10 }
  0x40   :  { %694 = vmatprep.subr.bf16.mxu1 %v872_v0  ;;  %v719_v60 = vpack.c.bf16 %v274_v59, %v273_v58  ;;  %v276_v62 = vld [vmem:[#allocation7 + $0x38] sm:$0xff]  ;;  %v278_v2 = vld [vmem:[#allocation7 + $0x48] sm:$0xff]  ;;  %v279_v4 = vld [vmem:[#allocation7 + $0x50] sm:$0xff] }
  0x41   :  { %575 = vmatmul.mubr.msk.f32.vlgmr.msra.gmra.mrb[0].mxu0 %vm78_vm1, %v55_v15  ;;  %v722_v63 = vpack.c.bf16 %v276_v62, %v275_v61  ;;  %v280_v5 = vld [vmem:[#allocation7 + $0x58] sm:$0xff]  ;;  %v281_v7 = vld [vmem:[#allocation7 + $0x60] sm:$0xff]  ;;  %v282_v8 = vld [vmem:[#allocation7 + $0x68] sm:$0xff] }
  0x42   :  { %644 = vmatprep.mubr.msk.f32.mxu0 %vm873_vm0, %v874_v1  ;;  %714 = vmatpush3.bf16.msra.mxu0 %v713_v54  ;;  %v728_v6 = vpack.c.bf16 %v280_v5, %v279_v4  ;;  %v731_v9 = vpack.c.bf16 %v282_v8, %v281_v7  ;;  %v283_v10 = vld [vmem:[#allocation7 + $0x70] sm:$0xff]  ;;  %v284_v11 = vld [vmem:[#allocation7 + $0x78] sm:$0xff]  ;;  %v285_v13 = vld [vmem:[#allocation7 + $0x80] sm:$0xff] }
  0x43   :  { %696 = vmatpush3.bf16.msra.mxu1 %v695_v18  ;;  %715 = vmatprep.subr.bf16.mxu0 %v872_v0  ;;  %v734_v12 = vpack.c.bf16 %v284_v11, %v283_v10  ;;  %v286_v14 = vld [vmem:[#allocation7 + $0x88] sm:$0xff]  ;;  %v287_v15 = vld [vmem:[#allocation7 + $0x90] sm:$0xff]  ;;  %v288_v17 = vld [vmem:[#allocation7 + $0x98] sm:$0xff] }
  0x44   :  { %697 = vmatprep.subr.bf16.mxu1 %v872_v0  ;;  %v737_v16 = vpack.c.bf16 %v286_v14, %v285_v13  ;;  %v740_v18 = vpack.c.bf16 %v288_v17, %v287_v15  ;;  %v289_v19 = vld [vmem:[#allocation7 + $0xa0] sm:$0xff]  ;;  %v290_v20 = vld [vmem:[#allocation7 + $0xa8] sm:$0xff]  ;;  %v291_v22 = vld [vmem:[#allocation7 + $0xb0] sm:$0xff] }
  0x45   :  { %v292_v23 = vld [vmem:[#allocation7 + $0xb8] sm:$0xff]  ;;  %v297_v52 = vld [vmem:[#allocation7 + $0xe0] sm:$0xff]  ;;  %v298_v53 = vld [vmem:[#allocation7 + $0xe8] sm:$0xff] }
  0x46   :  { %717 = vmatpush3.bf16.msra.mxu0 %v716_v57  ;;  %v755_v54 = vpack.c.bf16 %v298_v53, %v297_v52  ;;  %v299_v55 = vld [vmem:[#allocation7 + $0xf0] sm:$0xff]  ;;  %v300_v56 = vld [vmem:[#allocation7 + $0xf8] sm:$0xff]  ;;  %v509_v25 = vld [vmem:[#allocation7 + $0x101] ss:$0 sm:$0xff] }
  0x47   :  { %699 = vmatpush3.bf16.msra.mxu1 %v698_v21  ;;  %718 = vmatprep.subr.bf16.mxu0 %v872_v0  ;;  %v743_v21 = vpack.c.bf16 %v290_v20, %v289_v19  ;;  %v758_v57 = vpack.c.bf16 %v300_v56, %v299_v55 }
  0x48   :  { %700 = vmatprep.subr.bf16.mxu1 %v872_v0 }
  0x4a   :  { %720 = vmatpush3.bf16.msra.mxu0 %v719_v60 }
  0x4b   :  { %702 = vmatpush3.bf16.msra.mxu1 %v701_v24  ;;  %721 = vmatprep.subr.bf16.mxu0 %v872_v0  ;;  %v746_v24 = vpack.c.bf16 %v292_v23, %v291_v22  ;;  %v508_v23 = vld [vmem:[#allocation7 + $0x100] ss:$0 sm:$0xff] }
  0x4c   :  { %703 = vmatprep.subr.bf16.mxu1 %v872_v0 }
  0x4e   :  { %723 = vmatpush3.bf16.msra.mxu0 %v722_v63 }
  0x4f   :  { %705 = vmatpush3.bf16.msra.mxu1 %v704_v27  ;;  %724 = vmatprep.subr.bf16.mxu0 %v872_v0  ;;  %v248_v27 = vsub.s32 0, %v977_v26 }
  0x50   :  { %706 = vmatprep.subr.bf16.mxu1 %v872_v0 }
  0x53   :  { %708 = vmatpush3.bf16.msra.mxu1 %v707_v30 }
  0x54   :  { %709 = vmatprep.subr.bf16.mxu1 %v872_v0 }
  0x57   :  { %711 = vmatpush3.bf16.msra.mxu1 %v710_v33 }
  0x58   :  { %736 = vmatprep.subr.bf16.mxu1 %v872_v0 }
 0x114   :  { %v956_v34 = vpop.f32.mrb[0].mxu0 }
 0x115   :  { %v153_v35 = vsel %vm152_vm2, %v956_v34, 0.0  ;;  %v160_v36 = vmul.f32 %v956_v34, %v956_v34  ;;  %v576_v37 = vpop.f32.mrb[1].mxu0 }
 0x116   :  { %v154_v38 = vrot.slane %v153_v35, 4 }
 0x117   :  { %v161_v39 = vsel %vm152_vm2, %v160_v36, 0.0 }
 0x118   :  { %v155_v40 = vadd.f32 %v154_v38, %v153_v35  ;;  %v162_v41 = vrot.slane %v161_v39, 4  ;;  %v255_v38 = vsub.s32 1, %v977_v26 }
 0x11a   :  { %v156_v42 = vrot.slane %v155_v40, 2  ;;  %v163_v43 = vadd.f32 %v162_v41, %v161_v39  ;;  %v506_v41 = vld [vmem:[#allocation5 + $0xa0] ss:$0 sm:$0xff] }
 0x11c   :  { %v157_v44 = vadd.f32 %v156_v42, %v155_v40  ;;  %v164_v45 = vrot.slane %v163_v43, 2 }
 0x11e   :  { %v158_v46 = vrot.slane %v157_v44, 1  ;;  %v165_v47 = vadd.f32 %v164_v45, %v163_v43  ;;  %v507_v43 = vld [vmem:[#allocation5 + $0xa1] ss:$0 sm:$0xff] }
 0x120   :  { %v166_v48 = vrot.slane %v165_v47, 1  ;;  %v159_v49 = vadd.f32 %v158_v46, %v157_v44 }
 0x122   :  { %v167_v50 = vadd.f32 %v166_v48, %v165_v47  ;;  %v293_v47 = vld [vmem:[#allocation7 + $0xc0] sm:$0xff]  ;;  %v294_v48 = vld [vmem:[#allocation7 + $0xc8] sm:$0xff] }
 0x124   :  { %v169_v51 = vsel %vm168_vm3, %v159_v49, %v167_v50  ;;  %v749_v49 = vpack.c.bf16 %v294_v48, %v293_v47  ;;  %v296_v50 = vld [vmem:[#allocation7 + $0xd8] sm:$0xff] }
 0x125   :  { %610 = vmatmul.mubr.f32.vlgmr.msra.gmra.mrb[0].mxu1 %v169_v51 }
 0x126   :  { %679 = vmatprep.mubr.msk.f32.mxu1 %vm873_vm0, %v874_v1  ;;  %v277_v1 = vld [vmem:[#allocation7 + $0x40] sm:$0xff]  ;;  %738 = vmatpush3.bf16.msra.mxu1 %v737_v16 }
 0x127   :  { %v725_v3 = vpack.c.bf16 %v278_v2, %v277_v1  ;;  %739 = vmatprep.subr.bf16.mxu1 %v872_v0 }
 0x129   :  { %726 = vmatpush3.bf16.msra.mxu0 %v725_v3 }
 0x12a   :  { %727 = vmatprep.subr.bf16.mxu0 %v872_v0  ;;  %741 = vmatpush3.bf16.msra.mxu1 %v740_v18 }
 0x12b   :  { %742 = vmatprep.subr.bf16.mxu1 %v872_v0 }
 0x12d   :  { %729 = vmatpush3.bf16.msra.mxu0 %v728_v6 }
 0x12e   :  { %730 = vmatprep.subr.bf16.mxu0 %v872_v0  ;;  %744 = vmatpush3.bf16.msra.mxu1 %v743_v21 }
 0x12f   :  { %745 = vmatprep.subr.bf16.mxu1 %v872_v0 }
 0x131   :  { %732 = vmatpush3.bf16.msra.mxu0 %v731_v9 }
 0x132   :  { %733 = vmatprep.subr.bf16.mxu0 %v872_v0  ;;  %747 = vmatpush3.bf16.msra.mxu1 %v746_v24 }
 0x133   :  { %748 = vmatprep.subr.bf16.mxu1 %v872_v0 }
 0x135   :  { %735 = vmatpush3.bf16.msra.mxu0 %v734_v12 }
 0x136   :  { %750 = vmatpush3.bf16.msra.mxu1 %v749_v49 }
 0x137   :  { %751 = vmatprep.subr.bf16.mxu1 %v872_v0 }
 0x1f8   :  { %v236_v28 = vpop.f32.mrb[0].mxu1 }
 0x1f9   :  { %v240_v29 = vmul.f32 %v236_v28, %v236_v28  ;;  %v249_v30 = vrot.slane %v236_v28, %v248_v27  ;;  %v611_v31 = vpop.f32.mrb[1].mxu1 }
 0x1fb   :  { %v242_v32 = vrot.slane %v240_v29, 7  ;;  %v250_v33 = vsub.f32 %v956_v34, %v249_v30  ;;  %v295_v34 = vld [vmem:[#allocation7 + $0xd0] sm:$0xff] }
 0x1fc   :  { %v752_v51 = vpack.c.bf16 %v296_v50, %v295_v34 }
 0x1fd   :  { %v244_v35 = vsub.f32 %v236_v28, %v242_v32 }
 0x1fe   :  { %753 = vmatpush3.bf16.msra.mxu1 %v752_v51 }
 0x1ff   :  { %v245_v36 = vmax.f32 %v244_v35, 0.0  ;;  %754 = vmatprep.subr.bf16.mxu1 %v872_v0 }
 0x201   :  { %v251_v37 = vadd.f32 1e-05, %v245_v36 }
 0x202   :  { %756 = vmatpush3.bf16.msra.mxu1 %v755_v54 }
 0x203   :  { %769 = vrsqrt.f32 %v251_v37  ;;  %757 = vmatprep.subr.bf16.mxu1 %v872_v0 }
 0x206   :  { %759 = vmatpush3.bf16.msra.mxu1 %v758_v57 }
 0x20d   :  { %v770_v39 = vpop.eup %769 }
 0x20e   :  { %v256_v40 = vrot.slane %v770_v39, %v255_v38 }
 0x210   :  { %v257_v42 = vmul.f32 %v256_v40, %v250_v33 }
 0x212   :  { %v262_v44 = vmul.f32 %v506_v41, %v257_v42 }
 0x214   :  { %v267_v45 = vadd.f32 %v507_v43, %v262_v44 }
 0x216   :  { %v268_v46 = vmax.f32 %v267_v45, 0.0 }
 0x218   :  { %645 = vmatmul.mubr.f32.vlgmr.msra.gmra.mrb[2].mxu0 %v268_v46 }
 0x2eb   :  { %v369_v58 = vpop.f32.mrb[2].mxu0 }
 0x2ec   :  { %v373_v59 = vsel %vm152_vm2, %v369_v58, 0.0  ;;  %v380_v60 = vmul.f32 %v369_v58, %v369_v58  ;;  %v646_v61 = vpop.f32.mrb[3].mxu0 }
 0x2ed   :  { %v374_v62 = vrot.slane %v373_v59, 4 }
 0x2ee   :  { %v381_v63 = vsel %vm152_vm2, %v380_v60, 0.0 }
 0x2ef   :  { %v375_v1 = vadd.f32 %v374_v62, %v373_v59  ;;  %v382_v2 = vrot.slane %v381_v63, 4 }
 0x2f1   :  { %v376_v3 = vrot.slane %v375_v1, 2  ;;  %v383_v4 = vadd.f32 %v382_v2, %v381_v63 }
 0x2f3   :  { %v377_v5 = vadd.f32 %v376_v3, %v375_v1  ;;  %v384_v6 = vrot.slane %v383_v4, 2 }
 0x2f5   :  { %v378_v7 = vrot.slane %v377_v5, 1  ;;  %v385_v8 = vadd.f32 %v384_v6, %v383_v4 }
 0x2f7   :  { %v386_v9 = vrot.slane %v385_v8, 1  ;;  %v379_v0 = vadd.f32 %v378_v7, %v377_v5 }
 0x2f9   :  { %v387_v10 = vadd.f32 %v386_v9, %v385_v8 }
 0x2fb   :  { %v388_v11 = vsel %vm168_vm3, %v379_v0, %v387_v10 }
 0x2fc   :  { %680 = vmatmul.mubr.f32.vlgmr.msra.gmra.mrb[2].mxu1 %v388_v11 }
 0x3cf   :  { %v455_v12 = vpop.f32.mrb[2].mxu1 }
 0x3d0   :  { %v459_v13 = vmul.f32 %v455_v12, %v455_v12  ;;  %v468_v14 = vrot.slane %v455_v12, %v248_v27  ;;  %v681_v15 = vpop.f32.mrb[3].mxu1 }
 0x3d2   :  { %v461_v16 = vrot.slane %v459_v13, 7  ;;  %v469_v17 = vsub.f32 %v369_v58, %v468_v14 }
 0x3d4   :  { %v463_v18 = vsub.f32 %v455_v12, %v461_v16 }
 0x3d6   :  { %v464_v19 = vmax.f32 %v463_v18, 0.0 }
 0x3d8   :  { %v470_v20 = vadd.f32 1e-05, %v464_v19 }
 0x3da   :  { %771 = vrsqrt.f32 %v470_v20 }
 0x3e4   :  { %v772_v21 = vpop.eup %771 }
 0x3e5   :  { %v475_v22 = vrot.slane %v772_v21, %v255_v38 }
 0x3e7   :  { %v476_v24 = vmul.f32 %v475_v22, %v469_v17 }
 0x3e9   :  { %v481_v26 = vmul.f32 %v508_v23, %v476_v24 }
 0x3eb   :  { %v486_v28 = vadd.f32 %v509_v25, %v481_v26 }
 0x3ed   :  { %v487_v29 = vmax.f32 %v486_v28, 0.0 }
 0x3ef   :  { %488 = vst [vmem:[#allocation8] sm:$0x3] %v487_v29 }
 0x3f0   :  { %850 = shalt.err (!%p847_p0)
}
 0x3f1   :  { %s851_s25 = scalar_lea.hbm %s1003_s3, 32 }
 0x3f2   :  { %p852_p1 = scmp.ne.s32.totalorder %s1003_s3, %s851_s25  ;;  %p855_p2 = scmp.lt.u32.totalorder %s851_s25, %s1003_s3 }
 0x3f4   :  { %p857_p3 = pnand %p855_p2, %p852_p1 }
 0x3f6   :  { %860 = shalt.err (!%p857_p3)
}
 0x3f7   :  { %498 = dma.vmem_to_hbm [thread:$0]  %s496_s21, 32, %s1003_s3, [#allocation4]  }
 0x3f8   :  { %865 = dma.done.wait [#allocation4], 32  }
 0x3f9   :  { %866 = vsyncadd [#allocation4], 4294967264 }
 0x3fa   :  { %502 = vsyncpa [#allocation3], 1 }
 0x3fb   :  { %503 = vsyncpa [#allocation6], 1 }
 0x3fc   :  { %504 = vsyncpa [#allocation4], 1 }

</bundles_post_ra>
